<compile_context>
chip_gen: v7x
topology: tpu7x:2x2x1
jax: 0.10.0
libtpu: 0.0.40
codegen_flags: <defaults>
</compile_context>

<pallas_src>
import jax
import jax.numpy as jnp
from jax.experimental import pallas as pl
from jax.experimental.pallas import tpu as pltpu


def _round_up(n, m):
    return (n + m - 1) // m * m


def _fused_mlp_logsoftmax_kernel(x1_ref, x2_ref, wa_ref, ba_ref, wb_ref, bb_ref, out_ref):
    T = x1_ref.shape[0]              # rows per branch in this tile (multiple of 8)
    half = wa_ref.shape[1] // 2      # 50 hidden units per branch

    x1 = x1_ref[...]                              # (T, 300) f32
    x2 = x2_ref[...].astype(jnp.float32)          # int32 -> f32 (x2.type(FloatTensor))

    # Stack both branch inputs along batch. T % 8 == 0, so this is a
    # sublane-tile-aligned VMEM copy (no XLU relayout).
    xs = jnp.concatenate([x1, x2], axis=0)        # (2T, 300)

    # Fused first layer: one MXU matmul instead of two.
    # Wa = [w1a | w2a] (300, 100), ba = [b1a | b2a] (1, 100).
    h = jnp.dot(xs, wa_ref[...], preferred_element_type=jnp.float32) + ba_ref[...]
    h = jnp.maximum(h, 0.0)                       # (2T, 100)

    # Zero the cross terms so the fused second layer is block-diagonal:
    # branch-1 rows [:T] keep cols [:50]; branch-2 rows [T:] keep cols [50:].
    rows = jax.lax.broadcasted_iota(jnp.int32, h.shape, 0)
    cols = jax.lax.broadcasted_iota(jnp.int32, h.shape, 1)
    top = rows < T
    left = cols < half
    keep = jnp.logical_or(jnp.logical_and(top, left),
                          jnp.logical_and(jnp.logical_not(top), jnp.logical_not(left)))
    h = jnp.where(keep, h, 0.0)

    # Fused second layer: [h1, 0; 0, h2] @ [w1b ; w2b] = [h1@w1b ; h2@w2b].
    y = jnp.dot(h, wb_ref[...], preferred_element_type=jnp.float32)   # (2T, 10)

    # Per-branch second-layer bias (bb = [b1b ; b2b], shape (2, 10)).
    rows_o = jax.lax.broadcasted_iota(jnp.int32, y.shape, 0)
    y = y + jnp.where(rows_o < T, bb_ref[0:1, :], bb_ref[1:2, :])

    # Numerically stable log_softmax over the class axis (row-independent,
    # so no cross-branch concat is needed).
    m = jnp.max(y, axis=-1, keepdims=True)
    z = y - m
    lse = jnp.log(jnp.sum(jnp.exp(z), axis=-1, keepdims=True))
    ls = z - lse                                  # (2T, 10)

    # Store each branch's rows directly into the (2, T, 10) output block.
    out_ref[0] = ls[:T]
    out_ref[1] = ls[T:]


def multiple_input_net_different_dtypes(x1, x2, params, *, block_rows=512):
    """x1: float32 [B, 300]; x2: int32 [B, 300] (cast to float inside kernel)."""
    B, D_in = x1.shape
    (w1a, b1a, w1b, b1b, w2a, b2a, w2b, b2b) = params

    # One-time fusion of the branch weights (tiny; ~120 KB total, stays resident).
    wa = jnp.concatenate([w1a, w2a], axis=1)      # (300, 100)
    ba = jnp.concatenate([b1a, b2a], axis=1)      # (1, 100)
    wb = jnp.concatenate([w1b, w2b], axis=0)      # (100, 10)
    bb = jnp.concatenate([b1b, b2b], axis=0)      # (2, 10)
    D_out = wb.shape[1]

    # Batch tile: multiple of 8 sublanes, capped so double-buffered x1/x2 tiles
    # stay well inside scoped VMEM on v5e/v6e/v7x.
    T = min(block_rows, _round_up(B, 8))
    B_pad = _round_up(B, T)
    if B_pad != B:
        pad = ((0, B_pad - B), (0, 0))
        x1 = jnp.pad(x1, pad)
        x2 = jnp.pad(x2, pad)

    grid = (B_pad // T,)

    out3 = pl.pallas_call(
        _fused_mlp_logsoftmax_kernel,
        out_shape=jax.ShapeDtypeStruct((2, B_pad, D_out), jnp.float32),
        grid=grid,
        in_specs=[
            pl.BlockSpec((T, D_in), lambda i: (i, 0)),     # x1 batch tile
            pl.BlockSpec((T, D_in), lambda i: (i, 0)),     # x2 batch tile
            pl.BlockSpec(wa.shape, lambda i: (0, 0)),      # resident fused W (layer 1)
            pl.BlockSpec(ba.shape, lambda i: (0, 0)),      # resident fused bias (layer 1)
            pl.BlockSpec(wb.shape, lambda i: (0, 0)),      # resident fused W (layer 2)
            pl.BlockSpec(bb.shape, lambda i: (0, 0)),      # resident fused bias (layer 2)
        ],
        out_specs=pl.BlockSpec((2, T, D_out), lambda i: (0, i, 0)),
        compiler_params=pltpu.CompilerParams(
            dimension_semantics=("parallel",),             # shard batch across TCs (v7x)
        ),
    )(x1, x2, wa, ba, wb, bb)

    # (2, B, 10) -> (2B, 10): rows [0, B) = branch 1, rows [B, 2B) = branch 2,
    # matching torch.cat((y1, y2), dim=0). Row-major reshape is free.
    return out3[:, :B, :].reshape(2 * B, D_out)


def init_params(key):
    """Deterministic parameter init mirroring nn.Linear shapes.

    PyTorch nn.Linear(in, out) stores weight [out, in]; we store the transpose
    [in, out] so the kernel computes x @ W + b directly.
    Uses uniform(-1/sqrt(in), 1/sqrt(in)) like PyTorch's default init.
    """
    def linear(key, fan_in, fan_out):
        kw, kb = jax.random.split(key)
        bound = 1.0 / jnp.sqrt(jnp.float32(fan_in))
        w = jax.random.uniform(kw, (fan_in, fan_out), jnp.float32, -bound, bound)
        b = jax.random.uniform(kb, (1, fan_out), jnp.float32, -bound, bound)
        return w, b

    k1, k2, k3, k4 = jax.random.split(key, 4)
    w1a, b1a = linear(k1, 300, 50)
    w1b, b1b = linear(k2, 50, 10)
    w2a, b2a = linear(k3, 300, 50)
    w2b, b2b = linear(k4, 50, 10)
    return (w1a, b1a, w1b, b1b, w2a, b2a, w2b, b2b)


def _reference(x1, x2, params):
    (w1a, b1a, w1b, b1b, w2a, b2a, w2b, b2b) = params
    h1 = jax.nn.relu(x1 @ w1a + b1a)
    y1 = h1 @ w1b + b1b
    x2f = x2.astype(jnp.float32)
    h2 = jax.nn.relu(x2f @ w2a + b2a)
    y2 = h2 @ w2b + b2b
    y = jnp.concatenate([y1, y2], axis=0)
    return jax.nn.log_softmax(y, axis=1)


if __name__ == "__main__":
    key = jax.random.PRNGKey(0)
    k_p, k_x1, k_x2 = jax.random.split(key, 3)

    params = init_params(k_p)

    # Primary check: the module's natural small shape (batch=2).
    B = 2
    x1 = jax.random.normal(k_x1, (B, 300), dtype=jnp.float32)
    x2 = jax.random.randint(k_x2, (B, 300), minval=-5, maxval=5, dtype=jnp.int32)

    out = multiple_input_net_different_dtypes(x1, x2, params)
    out = jax.block_until_ready(out)
    ref = _reference(x1, x2, params)
    assert out.shape == (2 * B, 10), out.shape
    assert jnp.allclose(out, ref, atol=1e-5, rtol=1e-5), "mismatch vs JAX reference (B=2)"

    # Secondary check: exercise the multi-step batch grid + padding path.
    B2 = 20
    k_a, k_b = jax.random.split(jax.random.PRNGKey(1))
    x1b = jax.random.normal(k_a, (B2, 300), dtype=jnp.float32)
    x2b = jax.random.randint(k_b, (B2, 300), minval=-5, maxval=5, dtype=jnp.int32)
    out_b = multiple_input_net_different_dtypes(x1b, x2b, params, block_rows=8)
    out_b = jax.block_until_ready(out_b)
    ref_b = _reference(x1b, x2b, params)
    assert out_b.shape == (2 * B2, 10), out_b.shape
    assert jnp.allclose(out_b, ref_b, atol=1e-5, rtol=1e-5), "mismatch vs JAX reference (gridded)"

    print("KERNEL_OK")
</pallas_src>

<mosaic_0001>
module attributes {stable_mosaic.version = 11 : i64} {
  func.func @_fused_mlp_logsoftmax_kernel(%arg0: i32, %arg1: memref<8x300xf32, #tpu.memory_space<vmem>>, %arg2: memref<8x300xi32, #tpu.memory_space<vmem>>, %arg3: memref<300x100xf32, #tpu.memory_space<vmem>>, %arg4: memref<1x100xf32, #tpu.memory_space<vmem>>, %arg5: memref<100x10xf32, #tpu.memory_space<vmem>>, %arg6: memref<2x10xf32, #tpu.memory_space<vmem>>, %arg7: memref<2x8x10xf32, #tpu.memory_space<vmem>>) attributes {dimension_semantics = [#tpu.dimension_semantics<parallel>], iteration_bounds = array<i64: 1>, scalar_prefetch = 0 : i64, scratch_operands = 0 : i64, tpu.core_type = #tpu.core_type<tc>, window_params = [{transform_indices = @transform_0, window_bounds = array<i64: 8, 300>}, {transform_indices = @transform_1, window_bounds = array<i64: 8, 300>}, {pipeline_mode = #tpu.pipeline_mode<synchronous>, transform_indices = @transform_2, window_bounds = array<i64: 300, 100>}, {pipeline_mode = #tpu.pipeline_mode<synchronous>, transform_indices = @transform_3, window_bounds = array<i64: 1, 100>}, {pipeline_mode = #tpu.pipeline_mode<synchronous>, transform_indices = @transform_4, window_bounds = array<i64: 100, 10>}, {pipeline_mode = #tpu.pipeline_mode<synchronous>, transform_indices = @transform_5, window_bounds = array<i64: 2, 10>}, {transform_indices = @transform_6, window_bounds = array<i64: 2, 8, 10>}]} {
    %c0 = arith.constant 0 : index
    %c0_0 = arith.constant 0 : index
    %0 = vector.load %arg1[%c0, %c0_0] : memref<8x300xf32, #tpu.memory_space<vmem>>, vector<8x300xf32>
    %c0_1 = arith.constant 0 : index
    %c0_2 = arith.constant 0 : index
    %1 = vector.load %arg2[%c0_1, %c0_2] : memref<8x300xi32, #tpu.memory_space<vmem>>, vector<8x300xi32>
    %2 = arith.sitofp %1 : vector<8x300xi32> to vector<8x300xf32>
    %3 = tpu.concatenate %0, %2 in 0 : vector<8x300xf32>, vector<8x300xf32> -> vector<16x300xf32>
    %c0_3 = arith.constant 0 : index
    %c0_4 = arith.constant 0 : index
    %4 = vector.load %arg3[%c0_3, %c0_4] : memref<300x100xf32, #tpu.memory_space<vmem>>, vector<300x100xf32>
    %cst = arith.constant dense<0.000000e+00> : vector<16x100xf32>
    %5 = tpu.matmul %3, %4, %cst {dimension_numbers = #tpu.dot_dimension_numbers<[1], [0], [0], [1], [0, 0, 1, 1], [], []>} : vector<16x300xf32>, vector<300x100xf32>, vector<16x100xf32> -> vector<16x100xf32>
    %c0_5 = arith.constant 0 : index
    %c0_6 = arith.constant 0 : index
    %6 = vector.load %arg4[%c0_5, %c0_6] : memref<1x100xf32, #tpu.memory_space<vmem>>, vector<1x100xf32>
    %7 = vector.broadcast %6 : vector<1x100xf32> to vector<16x100xf32>
    %8 = arith.addf %5, %7 : vector<16x100xf32>
    %cst_7 = arith.constant 0.000000e+00 : f32
    %9 = vector.broadcast %cst_7 : f32 to vector<16x100xf32>
    %10 = arith.maximumf %8, %9 : vector<16x100xf32>
    %11 = tpu.iota {dimensions = array<i32: 0>} : vector<16x100xi32>
    %12 = tpu.iota {dimensions = array<i32: 1>} : vector<16x100xi32>
    %c8_i32 = arith.constant 8 : i32
    %13 = vector.broadcast %c8_i32 : i32 to vector<16x100xi32>
    %14 = arith.cmpi slt, %11, %13 : vector<16x100xi32>
    %c50_i32 = arith.constant 50 : i32
    %15 = vector.broadcast %c50_i32 : i32 to vector<16x100xi32>
    %16 = arith.cmpi slt, %12, %15 : vector<16x100xi32>
    %17 = arith.andi %14, %16 : vector<16x100xi1>
    %cst_8 = arith.constant dense<true> : vector<16x100xi1>
    %18 = arith.xori %14, %cst_8 : vector<16x100xi1>
    %cst_9 = arith.constant dense<true> : vector<16x100xi1>
    %19 = arith.xori %16, %cst_9 : vector<16x100xi1>
    %20 = arith.andi %18, %19 : vector<16x100xi1>
    %21 = arith.ori %17, %20 : vector<16x100xi1>
    %cst_10 = arith.constant 0.000000e+00 : f32
    %22 = vector.broadcast %cst_10 : f32 to vector<16x100xf32>
    %23 = arith.select %21, %10, %22 : vector<16x100xi1>, vector<16x100xf32>
    %c0_11 = arith.constant 0 : index
    %c0_12 = arith.constant 0 : index
    %24 = vector.load %arg5[%c0_11, %c0_12] : memref<100x10xf32, #tpu.memory_space<vmem>>, vector<100x10xf32>
    %cst_13 = arith.constant dense<0.000000e+00> : vector<16x10xf32>
    %25 = tpu.matmul %23, %24, %cst_13 {dimension_numbers = #tpu.dot_dimension_numbers<[1], [0], [0], [1], [0, 0, 1, 1], [], []>} : vector<16x100xf32>, vector<100x10xf32>, vector<16x10xf32> -> vector<16x10xf32>
    %26 = tpu.iota {dimensions = array<i32: 0>} : vector<16x10xi32>
    %c8_i32_14 = arith.constant 8 : i32
    %27 = vector.broadcast %c8_i32_14 : i32 to vector<16x10xi32>
    %28 = arith.cmpi slt, %26, %27 : vector<16x10xi32>
    %c0_15 = arith.constant 0 : index
    %c0_16 = arith.constant 0 : index
    %29 = vector.load %arg6[%c0_15, %c0_16] : memref<2x10xf32, #tpu.memory_space<vmem>>, vector<1x10xf32>
    %c1 = arith.constant 1 : index
    %c0_17 = arith.constant 0 : index
    %30 = vector.load %arg6[%c1, %c0_17] : memref<2x10xf32, #tpu.memory_space<vmem>>, vector<1x10xf32>
    %31 = vector.shape_cast %29 : vector<1x10xf32> to vector<1x10xf32>
    %32 = vector.broadcast %31 : vector<1x10xf32> to vector<16x10xf32>
    %33 = vector.shape_cast %30 : vector<1x10xf32> to vector<1x10xf32>
    %34 = vector.broadcast %33 : vector<1x10xf32> to vector<16x10xf32>
    %35 = arith.select %28, %32, %34 : vector<16x10xi1>, vector<16x10xf32>
    %36 = arith.addf %25, %35 : vector<16x10xf32>
    %cst_18 = arith.constant dense<0xFF800000> : vector<16xf32>
    %37 = vector.multi_reduction <maximumf>, %36, %cst_18 [1] : vector<16x10xf32> to vector<16xf32>
    %38 = vector.shape_cast %37 : vector<16xf32> to vector<16x1xf32>
    %39 = vector.broadcast %38 : vector<16x1xf32> to vector<16x10xf32>
    %40 = arith.subf %36, %39 : vector<16x10xf32>
    %41 = math.exp %40 : vector<16x10xf32>
    %cst_19 = arith.constant dense<0.000000e+00> : vector<16xf32>
    %42 = vector.multi_reduction <add>, %41, %cst_19 [1] : vector<16x10xf32> to vector<16xf32>
    %43 = vector.shape_cast %42 : vector<16xf32> to vector<16x1xf32>
    %44 = math.log %43 : vector<16x1xf32>
    %45 = vector.broadcast %44 : vector<16x1xf32> to vector<16x10xf32>
    %46 = arith.subf %40, %45 : vector<16x10xf32>
    %47 = vector.extract_strided_slice %46 {offsets = [0, 0], sizes = [8, 10], strides = [1, 1]} : vector<16x10xf32> to vector<8x10xf32>
    %c0_20 = arith.constant 0 : index
    %c0_21 = arith.constant 0 : index
    %c0_22 = arith.constant 0 : index
    %48 = vector.load %arg7[%c0_20, %c0_21, %c0_22] : memref<2x8x10xf32, #tpu.memory_space<vmem>>, vector<1x8x10xf32>
    %49 = vector.shape_cast %48 : vector<1x8x10xf32> to vector<8x10xf32>
    %50 = vector.shape_cast %47 : vector<8x10xf32> to vector<1x8x10xf32>
    tpu.vector_store %arg7[%c0_20, %c0_21, %c0_22], %50 {strides = array<i32>} : memref<2x8x10xf32, #tpu.memory_space<vmem>>, vector<1x8x10xf32>,
    %51 = vector.extract_strided_slice %46 {offsets = [8, 0], sizes = [8, 10], strides = [1, 1]} : vector<16x10xf32> to vector<8x10xf32>
    %c1_23 = arith.constant 1 : index
    %c0_24 = arith.constant 0 : index
    %c0_25 = arith.constant 0 : index
    %52 = vector.load %arg7[%c1_23, %c0_24, %c0_25] : memref<2x8x10xf32, #tpu.memory_space<vmem>>, vector<1x8x10xf32>
    %53 = vector.shape_cast %52 : vector<1x8x10xf32> to vector<8x10xf32>
    %54 = vector.shape_cast %51 : vector<8x10xf32> to vector<1x8x10xf32>
    tpu.vector_store %arg7[%c1_23, %c0_24, %c0_25], %54 {strides = array<i32>} : memref<2x8x10xf32, #tpu.memory_space<vmem>>, vector<1x8x10xf32>,
    return
  }
  func.func @transform_0(%arg0: i32) -> (i32, i32) {
    %c0_i32 = arith.constant 0 : i32
    %c0_i32_0 = arith.constant 0 : i32
    return %arg0, %c0_i32 : i32, i32
  }
  func.func @transform_1(%arg0: i32) -> (i32, i32) {
    %c0_i32 = arith.constant 0 : i32
    %c0_i32_0 = arith.constant 0 : i32
    return %arg0, %c0_i32 : i32, i32
  }
  func.func @transform_2(%arg0: i32) -> (i32, i32) {
    %c0_i32 = arith.constant 0 : i32
    %c0_i32_0 = arith.constant 0 : i32
    %c0_i32_1 = arith.constant 0 : i32
    return %c0_i32, %c0_i32_0 : i32, i32
  }
  func.func @transform_3(%arg0: i32) -> (i32, i32) {
    %c0_i32 = arith.constant 0 : i32
    %c0_i32_0 = arith.constant 0 : i32
    %c0_i32_1 = arith.constant 0 : i32
    return %c0_i32, %c0_i32_0 : i32, i32
  }
  func.func @transform_4(%arg0: i32) -> (i32, i32) {
    %c0_i32 = arith.constant 0 : i32
    %c0_i32_0 = arith.constant 0 : i32
    %c0_i32_1 = arith.constant 0 : i32
    return %c0_i32, %c0_i32_0 : i32, i32
  }
  func.func @transform_5(%arg0: i32) -> (i32, i32) {
    %c0_i32 = arith.constant 0 : i32
    %c0_i32_0 = arith.constant 0 : i32
    %c0_i32_1 = arith.constant 0 : i32
    return %c0_i32, %c0_i32_0 : i32, i32
  }
  func.func @transform_6(%arg0: i32) -> (i32, i32, i32) {
    %c0_i32 = arith.constant 0 : i32
    %c0_i32_0 = arith.constant 0 : i32
    %c0_i32_1 = arith.constant 0 : i32
    return %c0_i32, %arg0, %c0_i32_0 : i32, i32, i32
  }
}

</mosaic_0001>

<bundles_post_ra>
// kernel: tpu_custom_call.1
= control target key start
LH: loop header
LB: loop body
LE: loop exit
PB: predicated region body
PF: predicated region fallthrough
CT: control target
= control target key end

     0   :  { %11 = vsyncpa [#allocation3], 0  ;;  %s831_s0 = inlined_call_operand.vmem [shape: f32[8,300], index: 0, kind: input, shape index: {}]   ;;  %s832_s1 = inlined_call_operand.vmem [shape: s32[8,300], index: 1, kind: input, shape index: {}]   ;;  %s833_s2 = inlined_call_operand.hbm [shape: f32[300,100], index: 2, kind: input, shape index: {}]   ;;  %s834_s3 = inlined_call_operand.vmem [shape: f32[1,100], index: 3, kind: input, shape index: {}]   ;;  %s835_s4 = inlined_call_operand.vmem [shape: f32[100,10], index: 4, kind: input, shape index: {}]   ;;  %s836_s5 = inlined_call_operand.vmem [shape: f32[2,10], index: 5, kind: input, shape index: {}]   ;;  %s837_s6 = inlined_call_operand.hbm [shape: f32[2,8,10], index: 6, kind: output, shape index: {}]  }
   0x1   :  { %12 = vsyncpa [#allocation4], 0  ;;  %s674_s21 = smov [#allocation2]   ;;  %s626_s25 = scalar_lea.hbm %s833_s2, 4864 }
   0x2   :  { %s22_s22 = sshll.u32 %s674_s21, 4  ;;  %p627_p0 = scmp.ne.s32.totalorder %s833_s2, %s626_s25  ;;  %s23_s22 = int_to_ptr.vmem [resolvable:$true] %s22_s22 }
   0x3   :  { %p630_p1 = scmp.lt.u32.totalorder %s626_s25, %s833_s2 }
   0x5   :  { %p632_p2 = pnand %p630_p1, %p627_p0 }
   0x7   :  { %635 = shalt.err (!%p632_p2)
}
   0x8   :  { %s636_s30 = scalar_lea.vmem %s23_s22, 4864  ;;  %p641_p4 = scmp.lt.s32.totalorder %s23_s22, %s23_s22 }
   0x9   :  { %p637_p3 = scmp.ne.s32.totalorder %s23_s22, %s636_s30  ;;  %p642_p5 = scmp.lt.s32.totalorder %s636_s30, %s636_s30 }
   0xb   :  { %p643_p6 = por %p642_p5, %p641_p4 }
   0xd   :  { %p644_p7 = pnand %p643_p6, %p637_p3 }
   0xf   :  { %647 = shalt.err (!%p644_p7)
}
  0x10   :  { %s675_s7 = smov 128   ;;  %s676_s8 = smov 8  }
  0x11   :  { %28 = dma.hbm_to_vmem [thread:$0]  %s833_s2, 4864, %s23_s22, [#allocation3], %s675_s7, %s675_s7, %s676_s8  }
  0x12   :  { %670 = dma.done.wait [#allocation3], 4864  }
  0x13   :  { %671 = vsyncadd [#allocation3], 4294962432  ;;  %v63_v0 = vld [vmem:[#allocation2 + $0x80] sm:$0xff]  ;;  %v64_v1 = vld [vmem:[#allocation2 + $0x88] sm:$0xff]  ;;  %vm99_vm0 = vcmask 1043456   ;;  %vm92_vm1 = vcmask 359424  }
  0x14   :  { %v47_v2 = vld [vmem:[#allocation2] sm:$0xff]  ;;  %v543_v3 = vpack.c.bf16 %v64_v1, %v63_v0  ;;  %v48_v4 = vld [vmem:[#allocation2 + $0x8] sm:$0xff]  ;;  %v65_v5 = vld [vmem:[#allocation2 + $0x90] sm:$0xff]  ;;  %vm677_vm2 = vmmov 1   ;;  %vm299_vm5 = vcmask 818176   ;;  %vm384_vm7 = vcmask 80896  }
  0x15   :  { %v66_v6 = vld [vmem:[#allocation2 + $0x98] sm:$0xff]  ;;  %v545_v7 = vpack.c.bf16 %v48_v4, %v47_v2  ;;  %v49_v9 = vld [vmem:[#allocation2 + $0x10] sm:$0xff]  ;;  %v67_v11 = vld [vmem:[#allocation2 + $0xa0] sm:$0xff] }
  0x16   :  { %v547_v8 = vpack.c.bf16 %v66_v6, %v65_v5  ;;  %v50_v10 = vld [vmem:[#allocation2 + $0x18] sm:$0xff]  ;;  %544 = vmatprep.subr.bf16.mxu0 %v543_v3  ;;  %v68_v12 = vld [vmem:[#allocation2 + $0xa8] sm:$0xff]  ;;  %v51_v15 = vld [vmem:[#allocation2 + $0x20] sm:$0xff] }
  0x17   :  { %546 = vmatpush3.bf16.msra.mxu0 %v545_v7  ;;  %v549_v13 = vpack.c.bf16 %v50_v10, %v49_v9  ;;  %v551_v14 = vpack.c.bf16 %v68_v12, %v67_v11  ;;  %v52_v16 = vld [vmem:[#allocation2 + $0x28] sm:$0xff]  ;;  %v69_v17 = vld [vmem:[#allocation2 + $0xb0] sm:$0xff]  ;;  %v70_v18 = vld [vmem:[#allocation2 + $0xb8] sm:$0xff] }
  0x18   :  { %548 = vmatprep.subr.bf16.mxu0 %v547_v8  ;;  %v553_v19 = vpack.c.bf16 %v52_v16, %v51_v15  ;;  %v79_v20 = vld [vmem:[#allocation2 + $0x100] sm:$0xff]  ;;  %v555_v21 = vpack.c.bf16 %v70_v18, %v69_v17  ;;  %v53_v22 = vld [vmem:[#allocation2 + $0x30] sm:$0xff]  ;;  %v54_v23 = vld [vmem:[#allocation2 + $0x38] sm:$0xff] }
  0x19   :  { %v80_v24 = vld [vmem:[#allocation2 + $0x108] sm:$0xff]  ;;  %v71_v25 = vld [vmem:[#allocation2 + $0xc0] sm:$0xff]  ;;  %v81_v28 = vld [vmem:[#allocation2 + $0x110] sm:$0xff]  ;;  %v557_v30 = vpack.c.bf16 %v54_v23, %v53_v22 }
  0x1a   :  { %v72_v26 = vld [vmem:[#allocation2 + $0xc8] sm:$0xff]  ;;  %v575_v27 = vpack.c.bf16 %v80_v24, %v79_v20  ;;  %v82_v29 = vld [vmem:[#allocation2 + $0x118] sm:$0xff]  ;;  %v55_v31 = vld [vmem:[#allocation2 + $0x40] sm:$0xff]  ;;  %v258_v24 = vlaneseq }
  0x1b   :  { %550 = vmatpush3.bf16.msra.mxu0 %v549_v13  ;;  %v579_v32 = vpack.c.bf16 %v82_v29, %v81_v28  ;;  %v39_v33 = vld [vmem:[%s831_s0 + $0x8] sm:$0xff]  ;;  %v83_v34 = vld [vmem:[#allocation2 + $0x120] sm:$0xff]  ;;  %v559_v35 = vpack.c.bf16 %v72_v26, %v71_v25  ;;  %v40_v38 = vld [vmem:[%s831_s0 + $0x10] sm:$0xff] }
  0x1c   :  { %552 = vmatprep.subr.bf16.mxu0 %v551_v14  ;;  %576 = vmatprep.subr.bf16.mxu1 %v575_v27  ;;  %v56_v36 = vld [vmem:[#allocation2 + $0x48] sm:$0xff]  ;;  %v73_v39 = vld [vmem:[#allocation2 + $0xd0] sm:$0xff]  ;;  %v74_v40 = vld [vmem:[#allocation2 + $0xd8] sm:$0xff]  ;;  %v259_v29 = vand.u32 127, %v258_v24 }
  0x1d   :  { %578 = vmatpush3.bf16.msra.mxu1 %v575_v27  ;;  %v84_v37 = vld [vmem:[#allocation2 + $0x128] sm:$0xf]  ;;  %167 = vmatprep.mubr.f32.mxu0 %v39_v33  ;;  %vm737_vm3 = vmpackc.low %vm99_vm0, %vm677_vm2  ;;  %v274_v43 = vld [vmem:[%s835_s4] sm:$0xff]  ;;  %v561_v45 = vpack.c.bf16 %v56_v36, %v55_v31  ;;  %v563_v46 = vpack.c.bf16 %v74_v40, %v73_v39 }
  0x1e   :  { %580 = vmatprep.subr.bf16.mxu1 %v579_v32  ;;  %v583_v41 = vpack.c.bf16 %v84_v37, %v83_v34  ;;  %511 = vmatprep.mubr.msk.f32.mxu1 %vm92_vm1, %v40_v38  ;;  %v275_v44 = vld [vmem:[%s835_s4 + $0x8] sm:$0xff]  ;;  %v57_v47 = vld [vmem:[#allocation2 + $0x50] sm:$0xff]  ;;  %v58_v48 = vld [vmem:[#allocation2 + $0x58] sm:$0xff]  ;;  %vm262_vm4 = vcmp.lt.s32.totalorder %v259_v29, 50 }
  0x1f   :  { %554 = vmatpush3.bf16.msra.mxu0 %v553_v19  ;;  %v43_v49 = vld [vmem:[%s832_s1 + $0x10] sm:$0xff]  ;;  %v75_v50 = vld [vmem:[#allocation2 + $0xe0] sm:$0xff]  ;;  %v76_v51 = vld [vmem:[#allocation2 + $0xe8] sm:$0xff]  ;;  %v589_v52 = vpack.c.bf16 %v275_v44, %v274_v43  ;;  %v565_v55 = vpack.c.bf16 %v58_v48, %v57_v47 }
  0x20   :  { %556 = vmatprep.subr.bf16.mxu0 %v555_v21  ;;  %v276_v53 = vld [vmem:[%s835_s4 + $0x10] sm:$0xff]  ;;  %v277_v54 = vld [vmem:[%s835_s4 + $0x18] sm:$0xff]  ;;  %v46_v56 = vcvt.s32.f32 %v43_v49  ;;  %v567_v57 = vpack.c.bf16 %v76_v51, %v75_v50  ;;  %v59_v58 = vld [vmem:[#allocation2 + $0x60] sm:$0xff] }
  0x21   :  { %582 = vmatpush3.bf16.msra.mxu1 %v579_v32  ;;  %v60_v59 = vld [vmem:[#allocation2 + $0x68] sm:$0xff]  ;;  %v77_v60 = vld [vmem:[#allocation2 + $0xf0] sm:$0xff]  ;;  %v78_v61 = vld [vmem:[#allocation2 + $0xf8] sm:$0xff]  ;;  %v593_v62 = vpack.c.bf16 %v277_v54, %v276_v53 }
  0x22   :  { %585 = vmatprep.subr.msk.bf16.mxu1 %vm737_vm3, %v583_v41  ;;  %v278_v63 = vld [vmem:[%s835_s4 + $0x20] sm:$0xff]  ;;  %v279_v0 = vld [vmem:[%s835_s4 + $0x28] sm:$0xff]  ;;  %v569_v1 = vpack.c.bf16 %v60_v59, %v59_v58  ;;  %v571_v2 = vpack.c.bf16 %v78_v61, %v77_v60  ;;  %v61_v3 = vld [vmem:[#allocation2 + $0x70] sm:$0xff] }
  0x23   :  { %558 = vmatpush3.bf16.msra.mxu0 %v557_v30  ;;  %v62_v4 = vld [vmem:[#allocation2 + $0x78] sm:$0xff]  ;;  %v597_v5 = vpack.c.bf16 %v279_v0, %v278_v63  ;;  %v42_v7 = vld [vmem:[%s832_s1 + $0x8] sm:$0xff]  ;;  %v38_v8 = vld [vmem:[%s831_s0] sm:$0xff] }
  0x24   :  { %560 = vmatprep.subr.bf16.mxu0 %v559_v35  ;;  %v573_v6 = vpack.c.bf16 %v62_v4, %v61_v3  ;;  %v45_v9 = vcvt.s32.f32 %v42_v7  ;;  %v41_v10 = vld [vmem:[%s832_s1] sm:$0xff]  ;;  %v280_v12 = vld [vmem:[%s835_s4 + $0x30] sm:$0xff]  ;;  %v281_v13 = vld [vmem:[%s835_s4 + $0x38] sm:$0xff] }
  0x25   :  { %588 = vmatpush3.bf16.msk.msra.mxu1 %vm737_vm3, %v583_v41  ;;  %v44_v11 = vcvt.s32.f32 %v41_v10  ;;  %v601_v14 = vpack.c.bf16 %v281_v13, %v280_v12  ;;  %v282_v15 = vld [vmem:[%s835_s4 + $0x40] sm:$0xff]  ;;  %v283_v16 = vld [vmem:[%s835_s4 + $0x48] sm:$0xff]  ;;  %v284_v18 = vld [vmem:[%s835_s4 + $0x50] sm:$0xff] }
  0x26   :  { %590 = vmatprep.subr.bf16.mxu1 %v589_v52  ;;  %v605_v17 = vpack.c.bf16 %v283_v16, %v282_v15  ;;  %v285_v19 = vld [vmem:[%s835_s4 + $0x58] sm:$0xff]  ;;  %v286_v21 = vld [vmem:[%s835_s4 + $0x60] sm:$0xf]  ;;  %vm267_vm6 = vmxor %vm262_vm4, %vm677_vm2 }
  0x27   :  { %562 = vmatpush3.bf16.msra.mxu0 %v561_v45  ;;  %v609_v20 = vpack.c.bf16 %v285_v19, %v284_v18  ;;  %v429_v27 = vld [vmem:[%s834_s3] ss:$0 sm:$0xff]  ;;  %v434_v43 = vld [vmem:[%s836_s5 + $0x1] ss:$0 sm:$0xff] }
  0x28   :  { %564 = vmatprep.subr.bf16.mxu0 %v563_v46  ;;  %512 = vmatmul.mubr.msk.f32.vlgmr.msra.gmra.mrb[0].mxu1 %vm92_vm1, %v46_v56  ;;  %v433_v41 = vld [vmem:[%s836_s5] ss:$0 sm:$0xff]  ;;  %s678_s5 = smov [#allocation5]  }
  0x29   :  { %592 = vmatpush3.bf16.msra.mxu1 %v589_v52  ;;  %s417_s27 = sshll.u32 %s678_s5, 4  ;;  %s418_s27 = int_to_ptr.vmem [resolvable:$true] %s417_s27 }
  0x2a   :  { %594 = vmatprep.subr.bf16.mxu1 %v593_v62  ;;  %s648_s28 = scalar_lea.vmem %s418_s27, 256  ;;  %p653_p9 = scmp.lt.s32.totalorder %s418_s27, %s418_s27 }
  0x2b   :  { %566 = vmatpush3.bf16.msra.mxu0 %v565_v55  ;;  %p649_p8 = scmp.ne.s32.totalorder %s418_s27, %s648_s28  ;;  %p654_p10 = scmp.lt.s32.totalorder %s648_s28, %s648_s28 }
  0x2c   :  { %568 = vmatprep.subr.bf16.mxu0 %v567_v57 }
  0x2d   :  { %596 = vmatpush3.bf16.msra.mxu1 %v593_v62  ;;  %p655_p11 = por %p654_p10, %p653_p9 }
  0x2e   :  { %598 = vmatprep.subr.bf16.mxu1 %v597_v5 }
  0x2f   :  { %570 = vmatpush3.bf16.msra.mxu0 %v569_v1  ;;  %p656_p12 = pnand %p655_p11, %p649_p8 }
  0x30   :  { %572 = vmatprep.subr.bf16.mxu0 %v571_v2 }
  0x31   :  { %600 = vmatpush3.bf16.msra.mxu1 %v597_v5 }
  0x32   :  { %602 = vmatprep.subr.bf16.mxu1 %v601_v14 }
  0x33   :  { %574 = vmatpush3.bf16.msra.mxu0 %v573_v6 }
  0x35   :  { %604 = vmatpush3.bf16.msra.mxu1 %v601_v14 }
  0x36   :  { %168 = vmatmul.mubr.f32.vlgmr.msra.gmra.mrb[0].mxu0 %v38_v8  ;;  %606 = vmatprep.subr.bf16.mxu1 %v605_v17 }
  0x37   :  { %172 = vmatprep.mubr.f32.mxu0 %v45_v9 }
  0x39   :  { %608 = vmatpush3.bf16.msra.mxu1 %v605_v17 }
  0x3a   :  { %173 = vmatmul.mubr.f32.gmra.mrb[2].mxu0 %v44_v11  ;;  %610 = vmatprep.subr.bf16.mxu1 %v609_v20 }
  0x3d   :  { %612 = vmatpush3.bf16.msra.mxu1 %v609_v20 }
  0x3e   :  { %538 = vmatprep.subr.msk.mxu1 %vm99_vm0, %v286_v21 }
  0x41   :  { %539 = vmatpush3.msk.msra.mxu1 %vm99_vm0, %v286_v21 }
  0xfb   :  { %v513_v22 = vpop.f32.mrb[0].mxu1 }
  0xfc   :  { %v244_v23 = vpop.f32.mrb[1].mxu1 }
 0x109   :  { %v470_v25 = vpop.f32.mrb[0].mxu0 }
 0x10a   :  { %v471_v26 = vpop.f32.mrb[1].mxu0 }
 0x10b   :  { %v472_v28 = vadd.f32 %v471_v26, %v470_v25 }
 0x10d   :  { %v473_v30 = vpop.f32.mrb[2].mxu0  ;;  %v170_v31 = vadd.f32 %v472_v28, %v429_v27 }
 0x10e   :  { %v474_v32 = vpop.f32.mrb[3].mxu0 }
 0x10f   :  { %v475_v33 = vadd.f32 %v474_v32, %v473_v30  ;;  %v245_v34 = vadd.f32 %v244_v23, %v170_v31 }
 0x111   :  { %v175_v35 = vadd.f32 %v475_v33, %v429_v27  ;;  %v253_v36 = vmax.f32 %v245_v34, 0.0 }
 0x113   :  { %v250_v37 = vadd.f32 %v513_v22, %v175_v35  ;;  %v272_v38 = vsel %vm262_vm4, %v253_v36, 0.0 }
 0x114   :  { %540 = vmatprep.mubr.msk.f32.mxu1 %vm299_vm5, %v272_v38 }
 0x115   :  { %v254_v39 = vmax.f32 %v250_v37, 0.0 }
 0x117   :  { %v273_v40 = vsel %vm267_vm6, %v254_v39, 0.0 }
 0x118   :  { %541 = vmatmul.mubr.msk.f32.vlgmr.msra.gmra.mrb[2].mxu1 %vm299_vm5, %v273_v40 }
 0x1eb   :  { %v542_v42 = vpop.f32.mrb[2].mxu1 }
 0x1ec   :  { %v375_v44 = vpop.f32.mrb[3].mxu1  ;;  %v381_v46 = vadd.f32 %v542_v42, %v434_v43 }
 0x1ed   :  { %v376_v45 = vadd.f32 %v433_v41, %v375_v44 }
 0x1ee   :  { %v388_v48 = vsel %vm384_vm7, %v381_v46, -inf }
 0x1ef   :  { %v385_v47 = vsel %vm384_vm7, %v376_v45, -inf }
 0x1f0   :  { %386 = vmax.xlane.f32.xlu0 %v385_v47 }
 0x1f4   :  { %389 = vmax.xlane.f32.xlu0 %v388_v48 }
 0x27d   :  { %v387_v49 = vpop.xlane.xlu0 %386 }
 0x27e   :  { %v391_v50 = vsub.f32 %v376_v45, %v387_v49 }
 0x280   :  { %v393_v51 = vmul.f32 1.442695, %v391_v50 }
 0x281   :  { %v390_v52 = vpop.xlane.xlu0 %389 }
 0x282   :  { %618 = vpow2.f32 %v393_v51  ;;  %v392_v53 = vsub.f32 %v381_v46, %v390_v52 }
 0x284   :  { %v395_v54 = vmul.f32 1.442695, %v392_v53 }
 0x286   :  { %620 = vpow2.f32 %v395_v54 }
 0x28c   :  { %v619_v55 = vpop.eup %618 }
 0x28d   :  { %v397_v56 = vsel %vm384_vm7, %v619_v55, 0.0 }
 0x28e   :  { %398 = vadd.xlane.f32.xlu1 %v397_v56 }
 0x290   :  { %v621_v57 = vpop.eup %620 }
 0x291   :  { %v400_v58 = vsel %vm384_vm7, %v621_v57, 0.0 }
 0x292   :  { %401 = vadd.xlane.f32.xlu1 %v400_v58 }
 0x31b   :  { %v399_v59 = vpop.xlane.xlu1 %398 }
 0x31c   :  { %622 = vlog2.f32 %v399_v59 }
 0x31f   :  { %v402_v60 = vpop.xlane.xlu1 %401 }
 0x320   :  { %624 = vlog2.f32 %v402_v60 }
 0x326   :  { %v623_v61 = vpop.eup %622 }
 0x327   :  { %v404_v62 = vmul.f32 0.6931472, %v623_v61 }
 0x329   :  { %v407_v63 = vsub.f32 %v391_v50, %v404_v62 }
 0x32a   :  { %v625_v0 = vpop.eup %624 }
 0x32b   :  { %409 = vst.msk [vmem:[#allocation5] sm:$0xff] %vm384_vm7, %v407_v63  ;;  %v406_v1 = vmul.f32 0.6931472, %v625_v0 }
 0x32d   :  { %v408_v2 = vsub.f32 %v392_v53, %v406_v1 }
 0x32f   :  { %411 = vst.msk [vmem:[#allocation5 + $0x8] sm:$0xff] %vm384_vm7, %v408_v2 }
 0x330   :  { %659 = shalt.err (!%p656_p12)
}
 0x331   :  { %s660_s9 = scalar_lea.hbm %s837_s6, 256 }
 0x332   :  { %p661_p13 = scmp.ne.s32.totalorder %s837_s6, %s660_s9  ;;  %p664_p0 = scmp.lt.u32.totalorder %s660_s9, %s837_s6 }
 0x334   :  { %p666_p1 = pnand %p664_p0, %p661_p13 }
 0x336   :  { %669 = shalt.err (!%p666_p1)
}
 0x337   :  { %423 = dma.vmem_to_hbm [thread:$0]  %s418_s27, 256, %s837_s6, [#allocation4], %s675_s7, %s675_s7, %s676_s8  }
 0x338   :  { %672 = dma.done.wait [#allocation4], 256  }
 0x339   :  { %673 = vsyncadd [#allocation4], 4294967040 }
 0x33a   :  { %427 = vsyncpa [#allocation3], 1 }
 0x33b   :  { %428 = vsyncpa [#allocation4], 1 }

</bundles_post_ra>
